<compile_context>
chip_gen: v6e
topology: v6e:2x2x1
jax: 0.10.0
libtpu: 0.0.40
codegen_flags: <defaults>
</compile_context>

<pallas_src>
import jax
import jax.numpy as jnp
from jax.experimental import pallas as pl
from jax.experimental.pallas import tpu as pltpu


def _symmetric_logistic_loss_kernel(x_ref, y_ref, o_ref):
    # x_ref, y_ref: (1,) f32 in SMEM; o_ref: (1, 1) f32 in VMEM.
    p = x_ref[0] * y_ref[0]                         # scalar-core multiply
    pv = jnp.full((1, 1), p, dtype=jnp.float32)     # scalar -> vreg broadcast
    ap = jnp.abs(pv)                                # |x*y|
    # 0.5*|p| + log1p(exp(-|p|))  ==  (lse0(p) + lse0(-p)) / 2, numerically stable.
    o_ref[...] = 0.5 * ap + jnp.log1p(jnp.exp(-ap))


def symmetric_logistic_loss(x, y):
    """x, y: scalar-like arrays (shape () or (1,)), float32. Returns 0-d f32."""
    x = jnp.asarray(x, jnp.float32).reshape(1)
    y = jnp.asarray(y, jnp.float32).reshape(1)

    out = pl.pallas_call(
        _symmetric_logistic_loss_kernel,
        out_shape=jax.ShapeDtypeStruct((1, 1), jnp.float32),
        in_specs=[pl.BlockSpec(memory_space=pltpu.SMEM),
                  pl.BlockSpec(memory_space=pltpu.SMEM)],
        out_specs=pl.BlockSpec(memory_space=pltpu.VMEM),
    )(x, y)
    # PyTorch's logsumexp(dim=0) on a 1-D tensor returns a 0-d scalar.
    return out.reshape(())


def _reference(x, y):
    p = jnp.float32(x) * jnp.float32(y)
    return (jnp.logaddexp(0.0, -p) + jnp.logaddexp(0.0, p)) * 0.5


if __name__ == "__main__":
    # Deterministic "starting_point" (the module's two scalar parameters).
    key = jax.random.PRNGKey(0)
    kx, ky = jax.random.split(key)
    x0 = jax.random.normal(kx, (1,), dtype=jnp.float32)
    y0 = jax.random.normal(ky, (1,), dtype=jnp.float32)

    result = symmetric_logistic_loss(x0, y0)
    jax.block_until_ready(result)

    ref = _reference(x0[0], y0[0])
    assert jnp.allclose(result, ref, rtol=1e-5, atol=1e-6), (result, ref)

    print("KERNEL_OK")
</pallas_src>

<mosaic_0001>
module attributes {stable_mosaic.version = 11 : i64} {
  func.func @_symmetric_logistic_loss_kernel(%arg0: memref<1xf32, #tpu.memory_space<smem>>, %arg1: memref<1xf32, #tpu.memory_space<smem>>, %arg2: memref<1x1xf32, #tpu.memory_space<vmem>>) attributes {dimension_semantics = [], scalar_prefetch = 0 : i64, scratch_operands = 0 : i64, tpu.core_type = #tpu.core_type<tc>} {
    %c0 = arith.constant 0 : index
    %0 = memref.load %arg0[%c0] : memref<1xf32, #tpu.memory_space<smem>>
    %c0_0 = arith.constant 0 : index
    %1 = memref.load %arg1[%c0_0] : memref<1xf32, #tpu.memory_space<smem>>
    %2 = arith.mulf %0, %1 : f32
    %3 = vector.broadcast %2 : f32 to vector<1x1xf32>
    %4 = math.absf %3 : vector<1x1xf32>
    %cst = arith.constant 5.000000e-01 : f32
    %5 = vector.broadcast %cst : f32 to vector<1x1xf32>
    %6 = arith.mulf %5, %4 : vector<1x1xf32>
    %cst_1 = arith.constant 0.000000e+00 : f32
    %7 = vector.broadcast %cst_1 : f32 to vector<1x1xf32>
    %8 = arith.subf %7, %4 : vector<1x1xf32>
    %9 = math.exp %8 : vector<1x1xf32>
    %10 = math.log1p %9 : vector<1x1xf32>
    %11 = arith.addf %6, %10 : vector<1x1xf32>
    %c0_2 = arith.constant 0 : index
    %c0_3 = arith.constant 0 : index
    %12 = vector.load %arg2[%c0_2, %c0_3] : memref<1x1xf32, #tpu.memory_space<vmem>>, vector<1x1xf32>
    tpu.vector_store %arg2[%c0_2, %c0_3], %11 {strides = array<i32>} : memref<1x1xf32, #tpu.memory_space<vmem>>, vector<1x1xf32>,
    return
  }
}

</mosaic_0001>

<bundles_post_ra>
// kernel: tpu_custom_call.1
= control target key start
LH: loop header
LB: loop body
LE: loop exit
PB: predicated region body
PF: predicated region fallthrough
CT: control target
= control target key end

     0   :  { %s101_s0 = inlined_call_operand.<no memory space> [shape: f32[1], index: 0, kind: input, shape index: {}]   ;;  %s102_s1 = inlined_call_operand.<no memory space> [shape: f32[1], index: 1, kind: input, shape index: {}]   ;;  %s103_s2 = inlined_call_operand.hbm [shape: f32[1,1], index: 2, kind: output, shape index: {}]  }
   0x1   :  { %s16_s13 = smul.f32 %s102_s1, %s101_s0 }
   0x2   :  { %9 = vsyncpa [#allocation5], 0  ;;  %s76_s14 = smov [#allocation4]   ;;  %vm33_vm1 = vcmask 0  }
   0x3   :  { %v17_v0 = vstv %s16_s13  ;;  %s41_s15 = sshll.u32 %s76_s14, 4  ;;  %s42_s15 = int_to_ptr.vmem [resolvable:$true] %s41_s15 }
   0x4   :  { %v18_v1 = vand.u32 2147483647, %v17_v0  ;;  %s54_s0 = scalar_lea.vmem %s42_s15, 16  ;;  %s58_s1 = scalar_lea.vmem %s42_s15, 32 }
   0x5   :  { %p55_p0 = scmp.ne.s32.totalorder %s42_s15, %s54_s0  ;;  %p59_p1 = scmp.lt.s32.totalorder %s42_s15, %s42_s15 }
   0x6   :  { %v20_v2 = vsub.f32 0.0, %v18_v1  ;;  %v19_v11 = vmul.f32 0.5, %v18_v1  ;;  %p60_p2 = scmp.lt.s32.totalorder %s58_s1, %s54_s0 }
   0x8   :  { %v21_v3 = vmul.f32 1.442695, %v20_v2  ;;  %p61_p3 = por %p60_p2, %p59_p1 }
   0xa   :  { %50 = vpow2.f32 %v21_v3  ;;  %p62_p4 = pnand %p61_p3, %p55_p0 }
  0x17   :  { %v51_v4 = vpop.eup %50 }
  0x18   :  { %v23_v5 = vadd.f32 1.0, %v51_v4  ;;  %v26_v6 = vmul.f32 -0.5, %v51_v4  ;;  %v29_v8 = vand.u32 2147483647, %v51_v4 }
  0x1a   :  { %52 = vlog2.f32 %v23_v5  ;;  %v27_v7 = vadd.f32 1.0, %v26_v6  ;;  %vm30_vm0 = vcmp.lt.f32.partialorder %v29_v8, 0.0004427343 }
  0x1c   :  { %v28_v9 = vmul.f32 %v51_v4, %v27_v7 }
  0x27   :  { %v53_v10 = vpop.eup %52 }
  0x28   :  { %v25_v12 = vmul.f32 0.6931472, %v53_v10 }
  0x2a   :  { %v31_v13 = vsel %vm30_vm0, %v28_v9, %v25_v12 }
  0x2b   :  { %v32_v14 = vadd.f32 %v31_v13, %v19_v11 }
  0x2d   :  { %34 = vst.msk [vmem:[#allocation4] sm:$0x1] %vm33_vm1, %v32_v14 }
  0x2e   :  { %65 = shalt.err (!%p62_p4)
}
  0x2f   :  { %44 = dma.vmem_to_hbm [thread:$0]  %s42_s15, 16, %s103_s2, [#allocation5]  }
  0x30   :  { %74 = dma.done.wait [#allocation5], 16  }
  0x31   :  { %75 = vsyncadd [#allocation5], 4294967280 }
  0x32   :  { %48 = vsyncpa [#allocation5], 1 }

</bundles_post_ra>
